<compile_context>
chip_gen: v7x
topology: tpu7x:2x2x1
jax: 0.10.0
libtpu: 0.0.40
codegen_flags: <defaults>
</compile_context>

<pallas_src>
import math
import functools

import jax
import jax.numpy as jnp
from jax import lax
from jax.experimental import pallas as pl
from jax.experimental.pallas import tpu as pltpu


def _token_embedding_kernel(ids_ref, table_ref, out_ref, rows_ref, sem_ref,
                            *, scale, tb):
    """One grid step: gather `tb` embedding rows, scale, store densely.

    ids_ref   : SMEM int32[n_pad]        -- all (padded) token ids (scalar prefetch)
    table_ref : ANY/HBM [vocab, emb]     -- full embedding table (manual DMA source)
    out_ref   : VMEM (tb, emb)           -- output block for this grid step
    rows_ref  : VMEM (tb, emb) scratch   -- gather landing buffer
    sem_ref   : single DMA semaphore shared by this step's row copies
    """
    base = pl.program_id(0) * tb

    def _copy(t):
        row = ids_ref[base + t]
        return pltpu.make_async_copy(table_ref.at[row], rows_ref.at[t], sem_ref)

    # Issue all `tb` row gathers; they are concurrently in flight, which hides
    # the random-HBM-row latency without per-row semaphores.
    def _start(t, carry):
        _copy(t).start()
        return carry

    lax.fori_loop(0, tb, _start, 0)

    # Drain: each wait accounts for exactly one row-sized copy, so after `tb`
    # waits every gather has landed in rows_ref.
    def _wait(t, carry):
        _copy(t).wait()
        return carry

    lax.fori_loop(0, tb, _wait, 0)

    out_ref[...] = (rows_ref[...] * scale).astype(out_ref.dtype)


def token_embedding(tokens: jax.Array, emb_table: jax.Array,
                    *, block_tokens: int | None = None) -> jax.Array:
    """Equivalent of: nn.Embedding(vocab, emb)(tokens.long()) * sqrt(emb)."""
    vocab_size, emb_size = emb_table.shape
    scale = float(math.sqrt(emb_size))

    orig_shape = tuple(tokens.shape)
    flat_ids = jnp.asarray(tokens).reshape(-1).astype(jnp.int32)
    # PyTorch nn.Embedding raises on out-of-range ids; clamp so the row DMA is
    # always in-bounds.
    flat_ids = jnp.clip(flat_ids, 0, vocab_size - 1)
    n_tokens = int(flat_ids.shape[0])

    # Token-block size: big enough to amortize per-grid-step overhead, rows a
    # multiple of 8 so output stores are sublane-dense.
    if block_tokens is None:
        tb = 256 if n_tokens >= 256 else max(8, ((n_tokens + 7) // 8) * 8)
    else:
        tb = int(block_tokens)
    n_pad = ((n_tokens + tb - 1) // tb) * tb
    if n_pad != n_tokens:
        flat_ids = jnp.pad(flat_ids, (0, n_pad - n_tokens))  # pad ids -> row 0 (valid)

    grid = (n_pad // tb,)
    itemsize = jnp.dtype(emb_table.dtype).itemsize
    block_bytes = tb * emb_size * itemsize
    # Headroom for double-buffered output blocks + gather scratch.
    vmem_limit = int(min(max(32 * 2**20, 8 * block_bytes), 100 * 2**20))

    kernel = functools.partial(_token_embedding_kernel, scale=scale, tb=tb)

    cost = pl.CostEstimate(
        flops=int(n_pad * emb_size),
        transcendentals=0,
        bytes_accessed=int(2 * n_pad * emb_size * itemsize + n_pad * 4),
    )

    out_flat = pl.pallas_call(
        kernel,
        out_shape=jax.ShapeDtypeStruct((n_pad, emb_size), emb_table.dtype),
        grid_spec=pltpu.PrefetchScalarGridSpec(
            num_scalar_prefetch=1,           # flat_ids -> SMEM
            grid=grid,
            in_specs=[
                # Full table stays in HBM; rows are gathered by manual DMA.
                pl.BlockSpec(memory_space=pl.ANY),
            ],
            out_specs=pl.BlockSpec((tb, emb_size), lambda i, ids: (i, 0)),
            scratch_shapes=[
                pltpu.VMEM((tb, emb_size), emb_table.dtype),
                pltpu.SemaphoreType.DMA(()),
            ],
        ),
        compiler_params=pltpu.CompilerParams(
            dimension_semantics=("parallel",),
            vmem_limit_bytes=vmem_limit,
        ),
        cost_estimate=cost,
    )(flat_ids, emb_table)

    return out_flat[:n_tokens].reshape(*orig_shape, emb_size)


if __name__ == "__main__":
    vocab_size = 64
    emb_size = 32
    batch, seq = 2, 8

    key = jax.random.PRNGKey(0)
    k_emb, k_tok = jax.random.split(key)

    # Deterministic parameter init (nn.Embedding weight ~ N(0, 1)).
    emb_table = jax.random.normal(k_emb, (vocab_size, emb_size), dtype=jnp.float32)
    tokens = jax.random.randint(k_tok, (batch, seq), 0, vocab_size, dtype=jnp.int32)

    out = token_embedding(tokens, emb_table)
    jax.block_until_ready(out)

    # Reference check in plain JAX.
    ref = emb_table[tokens] * math.sqrt(emb_size)
    assert out.shape == (batch, seq, emb_size)
    assert jnp.allclose(out, ref, atol=1e-5, rtol=1e-5), "mismatch vs reference gather"

    # Also exercise the padding path (token count not a multiple of the block).
    tokens2 = jax.random.randint(jax.random.PRNGKey(1), (3, 5), 0, vocab_size,
                                 dtype=jnp.int32)
    out2 = token_embedding(tokens2, emb_table)
    jax.block_until_ready(out2)
    ref2 = emb_table[tokens2] * math.sqrt(emb_size)
    assert out2.shape == (3, 5, emb_size)
    assert jnp.allclose(out2, ref2, atol=1e-5, rtol=1e-5), "mismatch vs reference (padded)"

    print("KERNEL_OK")
</pallas_src>

<mosaic_0001>
module attributes {stable_mosaic.version = 11 : i64} {
  func.func @_token_embedding_kernel(%arg0: i32, %arg1: memref<16xi32, #tpu.memory_space<smem>>, %arg2: memref<64x32xf32, #tpu.memory_space<any>>, %arg3: memref<16x32xf32, #tpu.memory_space<vmem>>, %arg4: memref<16x32xf32, #tpu.memory_space<vmem>>, %arg5: memref<!tpu.dma_semaphore, #tpu.memory_space<semaphore_mem>>) attributes {dimension_semantics = [#tpu.dimension_semantics<parallel>], iteration_bounds = array<i64: 1>, scalar_prefetch = 1 : i64, scratch_operands = 2 : i64, tpu.core_type = #tpu.core_type<tc>, window_params = [{}, {transform_indices = @transform_1, window_bounds = array<i64: 16, 32>}]} {
    %c16_i32 = arith.constant 16 : i32
    %0 = arith.muli %arg0, %c16_i32 : i32
    %c0_i32 = arith.constant 0 : i32
    %c16_i32_0 = arith.constant 16 : i32
    %1 = arith.addi %c0_i32, %c16_i32_0 : i32
    %c1_i32 = arith.constant 1 : i32
    scf.for %arg6 = %c0_i32 to %1 step %c1_i32  : i32 {
      %7 = arith.addi %0, %arg6 : i32
      %8 = arith.index_cast %7 : i32 to index
      %9 = memref.load %arg1[%8] : memref<16xi32, #tpu.memory_space<smem>>
      %c0_i32_9 = arith.constant 0 : i32
      %10 = tpu.memref_slice %arg2[%9, %c0_i32_9] : memref<64x32xf32, #tpu.memory_space<any>> -> memref<1x32xf32, #tpu.memory_space<any>>
      %11 = tpu.memref_squeeze %10 : memref<1x32xf32, #tpu.memory_space<any>> -> memref<32xf32, #tpu.memory_space<any>>
      %c0_i32_10 = arith.constant 0 : i32
      %12 = tpu.memref_slice %arg4[%arg6, %c0_i32_10] : memref<16x32xf32, #tpu.memory_space<vmem>> -> memref<1x32xf32, #tpu.memory_space<vmem>>
      %13 = tpu.memref_squeeze %12 : memref<1x32xf32, #tpu.memory_space<vmem>> -> memref<32xf32, #tpu.memory_space<vmem>>
      tpu.enqueue_dma source(%11 : memref<32xf32, #tpu.memory_space<any>>) target(%13 : memref<32xf32, #tpu.memory_space<vmem>>) target_semaphore(%arg5 : memref<!tpu.dma_semaphore, #tpu.memory_space<semaphore_mem>>)
    }
    %c16_i32_1 = arith.constant 16 : i32
    %c0_i32_2 = arith.constant 0 : i32
    %c16_i32_3 = arith.constant 16 : i32
    %2 = arith.addi %c0_i32_2, %c16_i32_3 : i32
    %c1_i32_4 = arith.constant 1 : i32
    scf.for %arg6 = %c0_i32_2 to %2 step %c1_i32_4  : i32 {
      %7 = arith.addi %0, %arg6 : i32
      %8 = arith.index_cast %7 : i32 to index
      %9 = memref.load %arg1[%8] : memref<16xi32, #tpu.memory_space<smem>>
      %c0_i32_9 = arith.constant 0 : i32
      %10 = tpu.memref_slice %arg2[%9, %c0_i32_9] : memref<64x32xf32, #tpu.memory_space<any>> -> memref<1x32xf32, #tpu.memory_space<any>>
      %11 = tpu.memref_squeeze %10 : memref<1x32xf32, #tpu.memory_space<any>> -> memref<32xf32, #tpu.memory_space<any>>
      %c0_i32_10 = arith.constant 0 : i32
      %12 = tpu.memref_slice %arg4[%arg6, %c0_i32_10] : memref<16x32xf32, #tpu.memory_space<vmem>> -> memref<1x32xf32, #tpu.memory_space<vmem>>
      %13 = tpu.memref_squeeze %12 : memref<1x32xf32, #tpu.memory_space<vmem>> -> memref<32xf32, #tpu.memory_space<vmem>>
      tpu.wait_dma2 semaphore(%arg5 : memref<!tpu.dma_semaphore, #tpu.memory_space<semaphore_mem>>) src(%11 : memref<32xf32, #tpu.memory_space<any>>) dst(%13 : memref<32xf32, #tpu.memory_space<vmem>>)
    }
    %c16_i32_5 = arith.constant 16 : i32
    %c0 = arith.constant 0 : index
    %c0_6 = arith.constant 0 : index
    %3 = vector.load %arg4[%c0, %c0_6] : memref<16x32xf32, #tpu.memory_space<vmem>>, vector<16x32xf32>
    %cst = arith.constant 5.65685415 : f32
    %4 = vector.broadcast %cst : f32 to vector<16x32xf32>
    %5 = arith.mulf %3, %4 : vector<16x32xf32>
    %c0_7 = arith.constant 0 : index
    %c0_8 = arith.constant 0 : index
    %6 = vector.load %arg3[%c0_7, %c0_8] : memref<16x32xf32, #tpu.memory_space<vmem>>, vector<16x32xf32>
    tpu.vector_store %arg3[%c0_7, %c0_8], %5 {strides = array<i32>} : memref<16x32xf32, #tpu.memory_space<vmem>>, vector<16x32xf32>,
    return
  }
  func.func @transform_1(%arg0: i32, %arg1: memref<16xi32, #tpu.memory_space<smem>>) -> (i32, i32) {
    %c0_i32 = arith.constant 0 : i32
    %c0_i32_0 = arith.constant 0 : i32
    return %arg0, %c0_i32 : i32, i32
  }
}

</mosaic_0001>

<bundles_post_ra>
// kernel: tpu_custom_call.1
= control target key start
LH: loop header
LB: loop body
LE: loop exit
PB: predicated region body
PF: predicated region fallthrough
CT: control target
= control target key end

     0   :  { %s244_s0 = inlined_call_operand.vmem [shape: s32[16], index: 0, kind: input, shape index: {}]   ;;  %s245_s1 = inlined_call_operand.vmem [shape: f32[64,32], index: 1, kind: input, shape index: {}]   ;;  %s246_s2 = inlined_call_operand.hbm [shape: f32[16,32], index: 2, kind: output, shape index: {}]  }
   0x1   :  { %s7_s11 = sshll.u32 %s244_s0, 4  ;;  %s8_s11 = int_to_ptr.vmem [resolvable:$true] %s7_s11 }
   0x2   :  { %s151_s12 = scalar_lea.vmem %s8_s11, 16  ;;  %p156_p1 = scmp.lt.s32.totalorder %s8_s11, %s8_s11 }
   0x3   :  { %p152_p0 = scmp.ne.s32.totalorder %s8_s11, %s151_s12  ;;  %p157_p2 = scmp.lt.s32.totalorder %s151_s12, %s151_s12 }
   0x5   :  { %p158_p3 = por %p157_p2, %p156_p1 }
   0x7   :  { %p159_p4 = pnand %p158_p3, %p152_p0 }
   0x9   :  { %162 = shalt.err (!%p159_p4)  }
   0xa   :  { %s207_s13 = smov [#allocation5]  }
   0xb   :  { %10 = dma.vmem_to_smem %s8_s11, 16, %s207_s13, [#allocation4] }
   0xc   :  { %193 = dma.done.wait [#allocation4], 16 }
   0xd   :  { %194 = vsyncadd [#allocation4], 4294967280 }
   0xe   :  { %12 = sfence }
   0xf   :  { %13 = vsyncpa [#allocation7], 0  ;;  %s199_s14 = smov 0  }
  0x10 LB: > { %s22_s15 = sld [smem:[#allocation5 + %s201_s14]]  ;;  %s24_s18 = scalar_lea.vmem [#allocation2], %s201_s14  ;;  %s201_s14 = sphi %s199_s14, %s20_s14  }
  0x16   : > { %s23_s17 = scalar_lea.vmem %s245_s1, %s22_s15 }
  0x17   : > { %v42_v0 = vld [vmem:[%s23_s17] sm:$0x1] }
  0x18   : > { %43 = vst [vmem:[%s24_s18] sm:$0x1] %v42_v0 }
  0x19   : > { %68 = vsyncadd [#allocation3], 16  ;;  %s20_s14 = sadd.s32 1, %s201_s14  }
  0x1a   : > { %p17_p5 = scmp.ge.s32.totalorder %s20_s14, 16  }
  0x1b   :  { %s203_s19 = smov (%p17_p5), 0  }
  0x1c   :  { %19 = sbr.rel (!%p17_p5) target bundleno = 16 (0x10), region = 76 }
  0x23 LB: > { %195 = dma.done.wait [#allocation3], 16  ;;  %s205_s19 = sphi %s203_s19, %s74_s19  }
  0x24   : > { %196 = vsyncadd [#allocation3], 4294967280  ;;  %s74_s19 = sadd.s32 1, %s205_s19  }
  0x25   : > { %p71_p6 = scmp.ge.s32.totalorder %s74_s19, 16  }
  0x26   :  { %v79_v1 = vld [vmem:[#allocation2] sm:$0xff] (%p71_p6)  ;;  %vm83_vm0 = vcmask (%p71_p6), 261120   ;;  %v80_v2 = vld [vmem:[#allocation2 + $0x8] sm:$0xff] (%p71_p6)  ;;  %s208_s20 = smov (%p71_p6), [#allocation6]  }
  0x27   :  { %73 = sbr.rel (!%p71_p6) target bundleno = 35 (0x23), region = 87  ;;  %v81_v3 = vmul.f32 (%p71_p6), 5.656854, %v79_v1  ;;  %v82_v4 = vmul.f32 (%p71_p6), 5.656854, %v80_v2  ;;  %s91_s21 = sshll.u32 (%p71_p6), %s208_s20, 4  ;;  %s92_s21 = int_to_ptr.vmem [resolvable:$true] %s91_s21 }
  0x28   :  { %s163_s1 = scalar_lea.vmem (%p71_p6), %s92_s21, 256  ;;  %p168_p8 = scmp.lt.s32.totalorder (%p71_p6), %s92_s21, %s92_s21 }
  0x29   :  { %84 = vst.msk [vmem:[#allocation6] sm:$0xff] (%p71_p6), %vm83_vm0, %v81_v3  ;;  %85 = vst.msk [vmem:[#allocation6 + $0x8] sm:$0xff] (%p71_p6), %vm83_vm0, %v82_v4  ;;  %p164_p7 = scmp.ne.s32.totalorder (%p71_p6), %s92_s21, %s163_s1  ;;  %p169_p9 = scmp.lt.s32.totalorder (%p71_p6), %s163_s1, %s163_s1 }
  0x2b   :  { %p170_p10 = por (%p71_p6), %p169_p9, %p168_p8 }
  0x2d   :  { %p171_p11 = pnand (%p71_p6), %p170_p10, %p164_p7 }
  0x2f   :  { %174 = shalt.err (!%p171_p11)
}
  0x30   :  { %s175_s24 = scalar_lea.hbm %s246_s2, 256 }
  0x31   :  { %p176_p12 = scmp.ne.s32.totalorder %s246_s2, %s175_s24  ;;  %p179_p13 = scmp.lt.u32.totalorder %s175_s24, %s246_s2 }
  0x33   :  { %p181_p0 = pnand %p179_p13, %p176_p12 }
  0x35   :  { %184 = shalt.err (!%p181_p0)
}
  0x36   :  { %s209_s29 = smov 128   ;;  %s210_s30 = smov 8  }
  0x37   :  { %97 = dma.vmem_to_hbm [thread:$0]  %s92_s21, 256, %s246_s2, [#allocation7], %s209_s29, %s209_s29, %s210_s30  }
  0x38   :  { %197 = dma.done.wait [#allocation7], 256  }
  0x39   :  { %198 = vsyncadd [#allocation7], 4294967040 }
  0x3a   :  { %101 = vsyncpa [#allocation7], 1 }
  0x3b   :  { %102 = vsyncmov [#allocation3] }
  0x3e   :  { %s103_s5 = vpop.sfrf %102 }
  0x3f   :  { %p130_p1 = scmp.ne.s32.totalorder %s103_s5, 0 }
  0x41   :  { %107 = shalt.err (%p130_p1)  }

</bundles_post_ra>
